<compile_context>
chip_gen: v6e
topology: v6e:2x2x1
jax: 0.10.0
libtpu: 0.0.40
codegen_flags: <defaults>
</compile_context>

<pallas_src>
import jax
import jax.numpy as jnp
from jax.experimental import pallas as pl
from jax.experimental.pallas import tpu as pltpu

LANE = 128  # TPU vreg lane width


def _round_up(n, m):
    return ((n + m - 1) // m) * m


def _qnet_kernel(x_ref,
                 w1_ref, b1_ref,
                 w2_ref, b2_ref,
                 w3_ref, b3_ref,
                 wq_ref, bq_ref,
                 o_ref):
    """Fused forward for one batch tile: 3x (Linear + ReLU) + q_head Linear.

    Weights are bf16 [in, out]; activations are cast to bf16 only at the MXU
    inputs, accumulation and all VPU math (bias, ReLU) stay f32.
    """
    x = x_ref[...]

    h = jnp.dot(x.astype(jnp.bfloat16), w1_ref[...],
                preferred_element_type=jnp.float32) + b1_ref[...]
    h = jnp.maximum(h, 0.0)                       # ReLU (dropout1 = identity, eval)

    h = jnp.dot(h.astype(jnp.bfloat16), w2_ref[...],
                preferred_element_type=jnp.float32) + b2_ref[...]
    h = jnp.maximum(h, 0.0)                       # ReLU (dropout2 = identity, eval)

    h = jnp.dot(h.astype(jnp.bfloat16), w3_ref[...],
                preferred_element_type=jnp.float32) + b3_ref[...]
    h = jnp.maximum(h, 0.0)                       # ReLU (dropout3 = identity, eval)

    q = jnp.dot(h.astype(jnp.bfloat16), wq_ref[...],
                preferred_element_type=jnp.float32) + bq_ref[...]
    o_ref[...] = q.astype(o_ref.dtype)            # (TB, 128) lane-dense store


def local_network_forward(x, params, *, block_rows=1024):
    """x: [B, state_dim] float32.  params: dict from init_params()."""
    w1, b1 = params["w1"], params["b1"]
    w2, b2 = params["w2"], params["b2"]
    w3, b3 = params["w3"], params["b3"]
    wq, bq = params["wq"], params["bq"]            # out-features padded to 128
    action_dim = params["action_dim"]

    B, state_dim = x.shape
    n_pad = wq.shape[1]                            # multiple of LANE

    # Row tile: multiple of 8 sublanes; cap so tiny batches run one grid step.
    # VMEM/step (double-buffered x + out): 2*(TB*state_dim + TB*n_pad)*4B —
    # ~1.1 MiB at TB=1024, comfortably inside v7x's 32 MiB scoped default.
    tb = min(block_rows, _round_up(B, 8))
    b_pad = _round_up(B, tb)
    if b_pad != B:
        x = jnp.pad(x, ((0, b_pad - B), (0, 0)))

    grid = (pl.cdiv(b_pad, tb),)

    def resident(a):
        # Full (small) weight/bias array, same block every grid step ->
        # VMEM-resident across the batch loop.
        return pl.BlockSpec(a.shape, lambda i: (0,) * a.ndim)

    out = pl.pallas_call(
        _qnet_kernel,
        out_shape=jax.ShapeDtypeStruct((b_pad, n_pad), jnp.float32),
        grid=grid,
        in_specs=[
            pl.BlockSpec((tb, state_dim), lambda i: (i, 0)),
            resident(w1), resident(b1),
            resident(w2), resident(b2),
            resident(w3), resident(b3),
            resident(wq), resident(bq),
        ],
        out_specs=pl.BlockSpec((tb, n_pad), lambda i: (i, 0)),
        compiler_params=pltpu.CompilerParams(
            dimension_semantics=("parallel",)),   # v7x megacore; no-op v5e/v6e
    )(x, w1, b1, w2, b2, w3, b3, wq, bq)

    return out[:B, :action_dim]


def init_params(key, state_dim, hidden_dim, action_dim):
    """PyTorch-style init: U(-1/sqrt(fan_in), 1/sqrt(fan_in)).

    Weights stored as [in, out] (transposed vs. nn.Linear's [out, in]) in bf16
    for the MXU; biases stored as [1, out] in f32.  q_head out-features are
    zero-padded to a multiple of 128 for lane-dense output stores.
    """
    def linear(key, fan_in, fan_out, pad_out=None):
        kw, kb = jax.random.split(key)
        bound = 1.0 / jnp.sqrt(jnp.float32(fan_in))
        w = jax.random.uniform(kw, (fan_in, fan_out), jnp.float32, -bound, bound)
        b = jax.random.uniform(kb, (1, fan_out), jnp.float32, -bound, bound)
        if pad_out is not None and pad_out > fan_out:
            w = jnp.pad(w, ((0, 0), (0, pad_out - fan_out)))
            b = jnp.pad(b, ((0, 0), (0, pad_out - fan_out)))
        return w, b

    k1, k2, k3, kq = jax.random.split(key, 4)
    w1, b1 = linear(k1, state_dim, hidden_dim)
    w2, b2 = linear(k2, hidden_dim, hidden_dim)
    w3, b3 = linear(k3, hidden_dim, hidden_dim)
    wq, bq = linear(kq, hidden_dim, action_dim,
                    pad_out=_round_up(action_dim, LANE))

    return {"w1": w1.astype(jnp.bfloat16), "b1": b1,
            "w2": w2.astype(jnp.bfloat16), "b2": b2,
            "w3": w3.astype(jnp.bfloat16), "b3": b3,
            "wq": wq.astype(jnp.bfloat16), "bq": bq,
            "action_dim": action_dim}


def _reference_forward(x, p):
    """Pure-JAX reference with identical bf16-matmul / f32-accumulate semantics."""
    def lin(h, w, b):
        return jnp.dot(h.astype(jnp.bfloat16), w,
                       preferred_element_type=jnp.float32) + b
    h = jnp.maximum(lin(x, p["w1"], p["b1"]), 0.0)
    h = jnp.maximum(lin(h, p["w2"], p["b2"]), 0.0)
    h = jnp.maximum(lin(h, p["w3"], p["b3"]), 0.0)
    q = lin(h, p["wq"], p["bq"])
    return q[:, :p["action_dim"]]


if __name__ == "__main__":
    # Small shapes consistent with the module: state_dim=8, hidden=32, actions=4.
    B, STATE_DIM, HIDDEN_DIM, ACTION_DIM = 2, 8, 32, 4

    key = jax.random.PRNGKey(0)
    kx, kp, kx2 = jax.random.split(key, 3)
    params = init_params(kp, STATE_DIM, HIDDEN_DIM, ACTION_DIM)

    # 1) Tiny batch (single grid step, padded to 8 rows).
    x = jax.random.normal(kx, (B, STATE_DIM), jnp.float32)
    q_values = jax.block_until_ready(local_network_forward(x, params))
    ref = _reference_forward(x, params)
    assert q_values.shape == (B, ACTION_DIM)
    assert jnp.allclose(q_values, ref, atol=1e-3, rtol=1e-3), "mismatch (B=2)"

    # 2) Ragged batch exercising multi-step grid + row padding (TB=128, 3 steps).
    B2 = 300
    x2 = jax.random.normal(kx2, (B2, STATE_DIM), jnp.float32)
    q2 = jax.block_until_ready(local_network_forward(x2, params, block_rows=128))
    ref2 = _reference_forward(x2, params)
    assert q2.shape == (B2, ACTION_DIM)
    assert jnp.allclose(q2, ref2, atol=1e-3, rtol=1e-3), "mismatch (B=300)"

    print("KERNEL_OK")
</pallas_src>

<mosaic_0001>
module attributes {stable_mosaic.version = 11 : i64} {
  func.func @_qnet_kernel(%arg0: i32, %arg1: memref<8x8xf32, #tpu.memory_space<vmem>>, %arg2: memref<8x32xbf16, #tpu.memory_space<vmem>>, %arg3: memref<1x32xf32, #tpu.memory_space<vmem>>, %arg4: memref<32x32xbf16, #tpu.memory_space<vmem>>, %arg5: memref<1x32xf32, #tpu.memory_space<vmem>>, %arg6: memref<32x32xbf16, #tpu.memory_space<vmem>>, %arg7: memref<1x32xf32, #tpu.memory_space<vmem>>, %arg8: memref<32x128xbf16, #tpu.memory_space<vmem>>, %arg9: memref<1x128xf32, #tpu.memory_space<vmem>>, %arg10: memref<8x128xf32, #tpu.memory_space<vmem>>) attributes {dimension_semantics = [#tpu.dimension_semantics<parallel>], iteration_bounds = array<i64: 1>, scalar_prefetch = 0 : i64, scratch_operands = 0 : i64, tpu.core_type = #tpu.core_type<tc>, window_params = [{transform_indices = @transform_0, window_bounds = array<i64: 8, 8>}, {pipeline_mode = #tpu.pipeline_mode<synchronous>, transform_indices = @transform_1, window_bounds = array<i64: 8, 32>}, {pipeline_mode = #tpu.pipeline_mode<synchronous>, transform_indices = @transform_2, window_bounds = array<i64: 1, 32>}, {pipeline_mode = #tpu.pipeline_mode<synchronous>, transform_indices = @transform_3, window_bounds = array<i64: 32, 32>}, {pipeline_mode = #tpu.pipeline_mode<synchronous>, transform_indices = @transform_4, window_bounds = array<i64: 1, 32>}, {pipeline_mode = #tpu.pipeline_mode<synchronous>, transform_indices = @transform_5, window_bounds = array<i64: 32, 32>}, {pipeline_mode = #tpu.pipeline_mode<synchronous>, transform_indices = @transform_6, window_bounds = array<i64: 1, 32>}, {pipeline_mode = #tpu.pipeline_mode<synchronous>, transform_indices = @transform_7, window_bounds = array<i64: 32, 128>}, {pipeline_mode = #tpu.pipeline_mode<synchronous>, transform_indices = @transform_8, window_bounds = array<i64: 1, 128>}, {transform_indices = @transform_9, window_bounds = array<i64: 8, 128>}]} {
    %c0 = arith.constant 0 : index
    %c0_0 = arith.constant 0 : index
    %0 = vector.load %arg1[%c0, %c0_0] : memref<8x8xf32, #tpu.memory_space<vmem>>, vector<8x8xf32>
    %1 = arith.truncf %0 : vector<8x8xf32> to vector<8x8xbf16>
    %c0_1 = arith.constant 0 : index
    %c0_2 = arith.constant 0 : index
    %2 = vector.load %arg2[%c0_1, %c0_2] : memref<8x32xbf16, #tpu.memory_space<vmem>>, vector<8x32xbf16>
    %cst = arith.constant dense<0.000000e+00> : vector<8x32xf32>
    %3 = tpu.matmul %1, %2, %cst {dimension_numbers = #tpu.dot_dimension_numbers<[1], [0], [0], [1], [0, 0, 1, 1], [], []>} : vector<8x8xbf16>, vector<8x32xbf16>, vector<8x32xf32> -> vector<8x32xf32>
    %c0_3 = arith.constant 0 : index
    %c0_4 = arith.constant 0 : index
    %4 = vector.load %arg3[%c0_3, %c0_4] : memref<1x32xf32, #tpu.memory_space<vmem>>, vector<1x32xf32>
    %5 = vector.broadcast %4 : vector<1x32xf32> to vector<8x32xf32>
    %6 = arith.addf %3, %5 : vector<8x32xf32>
    %cst_5 = arith.constant 0.000000e+00 : f32
    %7 = vector.broadcast %cst_5 : f32 to vector<8x32xf32>
    %8 = arith.maximumf %6, %7 : vector<8x32xf32>
    %9 = arith.truncf %8 : vector<8x32xf32> to vector<8x32xbf16>
    %c0_6 = arith.constant 0 : index
    %c0_7 = arith.constant 0 : index
    %10 = vector.load %arg4[%c0_6, %c0_7] : memref<32x32xbf16, #tpu.memory_space<vmem>>, vector<32x32xbf16>
    %cst_8 = arith.constant dense<0.000000e+00> : vector<8x32xf32>
    %11 = tpu.matmul %9, %10, %cst_8 {dimension_numbers = #tpu.dot_dimension_numbers<[1], [0], [0], [1], [0, 0, 1, 1], [], []>} : vector<8x32xbf16>, vector<32x32xbf16>, vector<8x32xf32> -> vector<8x32xf32>
    %c0_9 = arith.constant 0 : index
    %c0_10 = arith.constant 0 : index
    %12 = vector.load %arg5[%c0_9, %c0_10] : memref<1x32xf32, #tpu.memory_space<vmem>>, vector<1x32xf32>
    %13 = vector.broadcast %12 : vector<1x32xf32> to vector<8x32xf32>
    %14 = arith.addf %11, %13 : vector<8x32xf32>
    %cst_11 = arith.constant 0.000000e+00 : f32
    %15 = vector.broadcast %cst_11 : f32 to vector<8x32xf32>
    %16 = arith.maximumf %14, %15 : vector<8x32xf32>
    %17 = arith.truncf %16 : vector<8x32xf32> to vector<8x32xbf16>
    %c0_12 = arith.constant 0 : index
    %c0_13 = arith.constant 0 : index
    %18 = vector.load %arg6[%c0_12, %c0_13] : memref<32x32xbf16, #tpu.memory_space<vmem>>, vector<32x32xbf16>
    %cst_14 = arith.constant dense<0.000000e+00> : vector<8x32xf32>
    %19 = tpu.matmul %17, %18, %cst_14 {dimension_numbers = #tpu.dot_dimension_numbers<[1], [0], [0], [1], [0, 0, 1, 1], [], []>} : vector<8x32xbf16>, vector<32x32xbf16>, vector<8x32xf32> -> vector<8x32xf32>
    %c0_15 = arith.constant 0 : index
    %c0_16 = arith.constant 0 : index
    %20 = vector.load %arg7[%c0_15, %c0_16] : memref<1x32xf32, #tpu.memory_space<vmem>>, vector<1x32xf32>
    %21 = vector.broadcast %20 : vector<1x32xf32> to vector<8x32xf32>
    %22 = arith.addf %19, %21 : vector<8x32xf32>
    %cst_17 = arith.constant 0.000000e+00 : f32
    %23 = vector.broadcast %cst_17 : f32 to vector<8x32xf32>
    %24 = arith.maximumf %22, %23 : vector<8x32xf32>
    %25 = arith.truncf %24 : vector<8x32xf32> to vector<8x32xbf16>
    %c0_18 = arith.constant 0 : index
    %c0_19 = arith.constant 0 : index
    %26 = vector.load %arg8[%c0_18, %c0_19] : memref<32x128xbf16, #tpu.memory_space<vmem>>, vector<32x128xbf16>
    %cst_20 = arith.constant dense<0.000000e+00> : vector<8x128xf32>
    %27 = tpu.matmul %25, %26, %cst_20 {dimension_numbers = #tpu.dot_dimension_numbers<[1], [0], [0], [1], [0, 0, 1, 1], [], []>} : vector<8x32xbf16>, vector<32x128xbf16>, vector<8x128xf32> -> vector<8x128xf32>
    %c0_21 = arith.constant 0 : index
    %c0_22 = arith.constant 0 : index
    %28 = vector.load %arg9[%c0_21, %c0_22] : memref<1x128xf32, #tpu.memory_space<vmem>>, vector<1x128xf32>
    %29 = vector.broadcast %28 : vector<1x128xf32> to vector<8x128xf32>
    %30 = arith.addf %27, %29 : vector<8x128xf32>
    %c0_23 = arith.constant 0 : index
    %c0_24 = arith.constant 0 : index
    %31 = vector.load %arg10[%c0_23, %c0_24] : memref<8x128xf32, #tpu.memory_space<vmem>>, vector<8x128xf32>
    tpu.vector_store %arg10[%c0_23, %c0_24], %30 {strides = array<i32>} : memref<8x128xf32, #tpu.memory_space<vmem>>, vector<8x128xf32>,
    return
  }
  func.func @transform_0(%arg0: i32) -> (i32, i32) {
    %c0_i32 = arith.constant 0 : i32
    %c0_i32_0 = arith.constant 0 : i32
    return %arg0, %c0_i32 : i32, i32
  }
  func.func @transform_1(%arg0: i32) -> (i32, i32) {
    %c0_i32 = arith.constant 0 : i32
    %c0_i32_0 = arith.constant 0 : i32
    %c0_i32_1 = arith.constant 0 : i32
    return %c0_i32, %c0_i32_0 : i32, i32
  }
  func.func @transform_2(%arg0: i32) -> (i32, i32) {
    %c0_i32 = arith.constant 0 : i32
    %c0_i32_0 = arith.constant 0 : i32
    %c0_i32_1 = arith.constant 0 : i32
    return %c0_i32, %c0_i32_0 : i32, i32
  }
  func.func @transform_3(%arg0: i32) -> (i32, i32) {
    %c0_i32 = arith.constant 0 : i32
    %c0_i32_0 = arith.constant 0 : i32
    %c0_i32_1 = arith.constant 0 : i32
    return %c0_i32, %c0_i32_0 : i32, i32
  }
  func.func @transform_4(%arg0: i32) -> (i32, i32) {
    %c0_i32 = arith.constant 0 : i32
    %c0_i32_0 = arith.constant 0 : i32
    %c0_i32_1 = arith.constant 0 : i32
    return %c0_i32, %c0_i32_0 : i32, i32
  }
  func.func @transform_5(%arg0: i32) -> (i32, i32) {
    %c0_i32 = arith.constant 0 : i32
    %c0_i32_0 = arith.constant 0 : i32
    %c0_i32_1 = arith.constant 0 : i32
    return %c0_i32, %c0_i32_0 : i32, i32
  }
  func.func @transform_6(%arg0: i32) -> (i32, i32) {
    %c0_i32 = arith.constant 0 : i32
    %c0_i32_0 = arith.constant 0 : i32
    %c0_i32_1 = arith.constant 0 : i32
    return %c0_i32, %c0_i32_0 : i32, i32
  }
  func.func @transform_7(%arg0: i32) -> (i32, i32) {
    %c0_i32 = arith.constant 0 : i32
    %c0_i32_0 = arith.constant 0 : i32
    %c0_i32_1 = arith.constant 0 : i32
    return %c0_i32, %c0_i32_0 : i32, i32
  }
  func.func @transform_8(%arg0: i32) -> (i32, i32) {
    %c0_i32 = arith.constant 0 : i32
    %c0_i32_0 = arith.constant 0 : i32
    %c0_i32_1 = arith.constant 0 : i32
    return %c0_i32, %c0_i32_0 : i32, i32
  }
  func.func @transform_9(%arg0: i32) -> (i32, i32) {
    %c0_i32 = arith.constant 0 : i32
    %c0_i32_0 = arith.constant 0 : i32
    return %arg0, %c0_i32 : i32, i32
  }
}

</mosaic_0001>

<bundles_post_ra>
// kernel: tpu_custom_call.1
= control target key start
LH: loop header
LB: loop body
LE: loop exit
PB: predicated region body
PF: predicated region fallthrough
CT: control target
= control target key end

     0   :  { %14 = vsyncpa [#allocation3], 0  ;;  %s684_s0 = inlined_call_operand.hbm [shape: f32[8,8], index: 0, kind: input, shape index: {}]   ;;  %s685_s1 = inlined_call_operand.hbm [shape: bf16[8,32], index: 1, kind: input, shape index: {}]   ;;  %s686_s2 = inlined_call_operand.vmem [shape: f32[1,32], index: 2, kind: input, shape index: {}]   ;;  %s687_s3 = inlined_call_operand.hbm [shape: bf16[32,32], index: 3, kind: input, shape index: {}]   ;;  %s688_s4 = inlined_call_operand.vmem [shape: f32[1,32], index: 4, kind: input, shape index: {}]   ;;  %s689_s5 = inlined_call_operand.hbm [shape: bf16[32,32], index: 5, kind: input, shape index: {}]   ;;  %s690_s6 = inlined_call_operand.vmem [shape: f32[1,32], index: 6, kind: input, shape index: {}]   ;;  %s691_s7 = inlined_call_operand.hbm [shape: bf16[32,128], index: 7, kind: input, shape index: {}]   ;;  %s692_s8 = inlined_call_operand.vmem [shape: f32[1,128], index: 8, kind: input, shape index: {}]   ;;  %s693_s9 = inlined_call_operand.hbm [shape: f32[8,128], index: 9, kind: output, shape index: {}]  }
   0x1   :  { %15 = vsyncpa [#allocation6], 0 }
   0x2   :  { %16 = vsyncpa [#allocation9], 0 }
   0x3   :  { %17 = vsyncpa [#allocation4], 0  ;;  %s578_s30 = smov [#allocation5]  }
   0x4   :  { %s34_s10 = sshll.u32 %s578_s30, 4  ;;  %s35_s10 = int_to_ptr.vmem [resolvable:$true] %s34_s10 }
   0x5   :  { %s458_s11 = scalar_lea.vmem %s35_s10, 64  ;;  %p463_p1 = scmp.lt.s32.totalorder %s35_s10, %s35_s10 }
   0x6   :  { %p459_p0 = scmp.ne.s32.totalorder %s35_s10, %s458_s11  ;;  %p464_p2 = scmp.lt.s32.totalorder %s458_s11, %s458_s11 }
   0x8   :  { %p465_p3 = por %p464_p2, %p463_p1 }
   0xa   :  { %p466_p4 = pnand %p465_p3, %p459_p0 }
   0xc   :  { %469 = shalt.err (!%p466_p4)
}
   0xd   :  { %37 = dma.hbm_to_vmem [thread:$0]  %s685_s1, 64, %s35_s10, [#allocation6]  }
   0xe   :  { %s579_s14 = smov [#allocation8]   ;;  %s580_s16 = smov [#allocation2]  }
   0xf   :  { %s59_s15 = sshll.u32 %s579_s14, 4  ;;  %s24_s17 = sshll.u32 %s580_s16, 4  ;;  %s60_s15 = int_to_ptr.vmem [resolvable:$true] %s59_s15  ;;  %s25_s17 = int_to_ptr.vmem [resolvable:$true] %s24_s17 }
  0x10   :  { %s478_s18 = scalar_lea.vmem %s60_s15, 256  ;;  %p483_p6 = scmp.lt.s32.totalorder %s60_s15, %s60_s15 }
  0x11   :  { %p479_p5 = scmp.ne.s32.totalorder %s60_s15, %s478_s18  ;;  %p484_p7 = scmp.lt.s32.totalorder %s478_s18, %s478_s18 }
  0x13   :  { %p485_p8 = por %p484_p7, %p483_p6 }
  0x15   :  { %p486_p9 = pnand %p485_p8, %p479_p5 }
  0x17   :  { %489 = shalt.err (!%p486_p9)
}
  0x18   :  { %s581_s19 = smov 64   ;;  %s582_s20 = smov 4  }
  0x19   :  { %65 = dma.hbm_to_vmem [thread:$0]  %s689_s5, 256, %s60_s15, [#allocation9], %s581_s19, %s581_s19, %s582_s20  }
  0x1a   :  { %s498_s1 = scalar_lea.vmem %s25_s17, 128  ;;  %p503_p11 = scmp.lt.s32.totalorder %s25_s17, %s25_s17 }
  0x1b   :  { %p499_p10 = scmp.ne.s32.totalorder %s25_s17, %s498_s1  ;;  %p504_p12 = scmp.lt.s32.totalorder %s498_s1, %s498_s1 }
  0x1d   :  { %p505_p13 = por %p504_p12, %p503_p11 }
  0x1f   :  { %p506_p0 = pnand %p505_p13, %p499_p10 }
  0x21   :  { %509 = shalt.err (!%p506_p0)
}
  0x22   :  { %27 = dma.hbm_to_vmem [thread:$0]  %s684_s0, 128, %s25_s17, [#allocation3]  }
  0x23   :  { %s583_s25 = smov [#allocation7]   ;;  %s584_s27 = smov [#allocation10]  }
  0x24   :  { %s45_s26 = sshll.u32 %s583_s25, 4  ;;  %s73_s28 = sshll.u32 %s584_s27, 4  ;;  %s46_s26 = int_to_ptr.vmem [resolvable:$true] %s45_s26  ;;  %s74_s28 = int_to_ptr.vmem [resolvable:$true] %s73_s28 }
  0x25   :  { %s518_s29 = scalar_lea.vmem %s46_s26, 256  ;;  %p523_p2 = scmp.lt.s32.totalorder %s46_s26, %s46_s26 }
  0x26   :  { %p519_p1 = scmp.ne.s32.totalorder %s46_s26, %s518_s29  ;;  %p524_p3 = scmp.lt.s32.totalorder %s518_s29, %s518_s29 }
  0x28   :  { %p525_p4 = por %p524_p3, %p523_p2 }
  0x2a   :  { %p526_p5 = pnand %p525_p4, %p519_p1 }
  0x2c   :  { %529 = shalt.err (!%p526_p5)
}
  0x2d   :  { %51 = dma.hbm_to_vmem [thread:$0]  %s687_s3, 256, %s46_s26, [#allocation6], %s581_s19, %s581_s19, %s582_s20  }
  0x2e   :  { %s538_s0 = scalar_lea.vmem %s74_s28, 256  ;;  %p543_p7 = scmp.lt.s32.totalorder %s74_s28, %s74_s28 }
  0x2f   :  { %p539_p6 = scmp.ne.s32.totalorder %s74_s28, %s538_s0  ;;  %p544_p8 = scmp.lt.s32.totalorder %s538_s0, %s538_s0 }
  0x31   :  { %p545_p9 = por %p544_p8, %p543_p7 }
  0x33   :  { %p546_p10 = pnand %p545_p9, %p539_p6 }
  0x35   :  { %549 = shalt.err (!%p546_p10)
}
  0x36   :  { %79 = dma.hbm_to_vmem [thread:$0]  %s691_s7, 256, %s74_s28, [#allocation9], %s581_s19, %s581_s19, %s582_s20  }
  0x37   :  { %570 = dma.done.wait [#allocation3], 128  }
  0x38   :  { %571 = vsyncadd [#allocation3], 4294967168 }
  0x39   :  { %572 = dma.done.wait [#allocation6], 320  }
  0x3a   :  { %573 = vsyncadd [#allocation6], 4294966976 }
  0x3b   :  { %574 = dma.done.wait [#allocation9], 512  }
  0x3c   :  { %575 = vsyncadd [#allocation9], 4294966784  ;;  %v585_v0 = vmov 0.0   ;;  %vm586_vm0 = vmmov 0   ;;  %vm112_vm1 = vcmask 1043456   ;;  %v98_v2 = vld [vmem:[#allocation2] sm:$0xff] }
  0x3d   :  { %404 = vmatprep.subr.bf16.mxu0 %v585_v0  ;;  %406 = vmatprep.mubr.msk.bf16.mxu0 %vm586_vm0, %v585_v0  ;;  %v100_v1 = vld [vmem:[#allocation5] sm:$0xf]  ;;  %v99_v4 = vpack.c.bf16 %v98_v2, %v98_v2  ;;  %vm108_vm2 = vcmask 64512   ;;  %v444_v5 = vld [vmem:[#allocation7 + $0x8] sm:$0xff]   ;;  %v445_v6 = vld [vmem:[#allocation7] sm:$0xff]   ;;  %vm181_vm3 = vcmask 261120  }
  0x3e   :  { %410 = vmatprep.subr.bf16.mxu1 %v585_v0  ;;  %414 = vmatprep.mubr.msk.bf16.mxu1 %vm586_vm0, %v585_v0  ;;  %v114_v3 = vsel %vm112_vm1, %v100_v1, 0  ;;  %v446_v7 = vld [vmem:[#allocation8 + $0x8] sm:$0xff]   ;;  %v379_v8 = vld [vmem:[%s686_s2] ss:$0 sm:$0xff]  ;;  %v448_v17 = vld [vmem:[#allocation10 + $0x8] sm:$0xff]   ;;  %s587_s16 = smov [#allocation11]  }
  0x3f   :  { %405 = vmatpush3.bf16.msra.mxu0 %v114_v3  ;;  %411 = vmatpush3.bf16.msra.mxu1 %v444_v5  ;;  %v447_v16 = vld [vmem:[#allocation8] sm:$0xff]   ;;  %v449_v26 = vld [vmem:[#allocation10] sm:$0xff]   ;;  %s368_s17 = sshll.u32 %s587_s16, 4  ;;  %s369_s17 = int_to_ptr.vmem [resolvable:$true] %s368_s17 }
  0x40   :  { %418 = vmatprep.subr.bf16.mxu0 %v585_v0  ;;  %412 = vmatprep.subr.bf16.mxu1 %v585_v0  ;;  %v381_v18 = vld [vmem:[%s688_s4] ss:$0 sm:$0xff]  ;;  %p555_p12 = scmp.lt.s32.totalorder %s369_s17, %s369_s17 }
  0x41   :  { %v385_v27 = vld [vmem:[%s690_s6] ss:$0 sm:$0xff]  ;;  %s550_s6 = scalar_lea.vmem %s369_s17, 128 }
  0x42   :  { %407 = vmatmul.mubr.msk.bf16.vlgmr.msra.gmra.mxu0 %vm108_vm2, %v99_v4  ;;  %v389_v35 = vld [vmem:[%s692_s8] ss:$0 sm:$0xff]  ;;  %p551_p11 = scmp.ne.s32.totalorder %s369_s17, %s550_s6  ;;  %p556_p13 = scmp.lt.s32.totalorder %s550_s6, %s550_s6 }
  0x43   :  { %422 = vmatprep.mubr.msk.bf16.mxu0 %vm586_vm0, %v585_v0  ;;  %413 = vmatpush3.bf16.msra.mxu1 %v445_v6 }
  0x44   :  { %426 = vmatprep.subr.bf16.mxu1 %v585_v0  ;;  %419 = vmatpush3.bf16.msra.mxu0 %v446_v7  ;;  %p557_p0 = por %p556_p13, %p555_p12 }
  0x45   :  { %420 = vmatprep.subr.bf16.mxu0 %v585_v0 }
  0x46   :  { %p558_p1 = pnand %p557_p0, %p551_p11 }
  0x48   :  { %421 = vmatpush3.bf16.msra.mxu0 %v447_v16 }
 0x102   :  { %v150_v9 = vpop.f32.mrf.mxu0 }
 0x103   :  { %v151_v10 = vadd.f32 %v379_v8, %v150_v9 }
 0x104   :  { %v408_v11 = vpop.f32.mrf.mxu0 }
 0x105   :  { %v156_v12 = vmax.f32 %v151_v10, 0.0 }
 0x106   :  { %v153_v13 = vpop.f32.mrf.mxu0 }
 0x107   :  { %v157_v14 = vpack.c.bf16 %v156_v12, %v156_v12 }
 0x108   :  { %v409_v15 = vpop.f32.mrf.mxu0 }
 0x109   :  { %415 = vmatmul.mubr.msk.bf16.vlgmr.msra.gmra.mxu1 %vm181_vm3, %v157_v14 }
 0x10a   :  { %430 = vmatprep.mubr.msk.bf16.mxu1 %vm586_vm0, %v585_v0  ;;  %427 = vmatpush3.bf16.msra.mxu1 %v448_v17 }
 0x10b   :  { %428 = vmatprep.subr.bf16.mxu1 %v585_v0 }
 0x10e   :  { %429 = vmatpush3.bf16.msra.mxu1 %v449_v26 }
 0x1c9   :  { %v219_v19 = vpop.f32.mrf.mxu1 }
 0x1ca   :  { %v220_v20 = vadd.f32 %v381_v18, %v219_v19 }
 0x1cb   :  { %v416_v21 = vpop.f32.mrf.mxu1 }
 0x1cc   :  { %v225_v22 = vmax.f32 %v220_v20, 0.0 }
 0x1cd   :  { %v222_v23 = vpop.f32.mrf.mxu1 }
 0x1ce   :  { %v226_v24 = vpack.c.bf16 %v225_v22, %v225_v22 }
 0x1cf   :  { %v417_v25 = vpop.f32.mrf.mxu1 }
 0x1d0   :  { %423 = vmatmul.mubr.msk.bf16.vlgmr.msra.gmra.mxu0 %vm181_vm3, %v226_v24 }
 0x290   :  { %v287_v28 = vpop.f32.mrf.mxu0 }
 0x291   :  { %v288_v29 = vadd.f32 %v385_v27, %v287_v28 }
 0x292   :  { %v424_v30 = vpop.f32.mrf.mxu0 }
 0x293   :  { %v293_v31 = vmax.f32 %v288_v29, 0.0 }
 0x294   :  { %v290_v32 = vpop.f32.mrf.mxu0 }
 0x295   :  { %v294_v33 = vpack.c.bf16 %v293_v31, %v293_v31 }
 0x296   :  { %v425_v34 = vpop.f32.mrf.mxu0 }
 0x297   :  { %431 = vmatmul.mubr.msk.bf16.vlgmr.msra.gmra.mxu1 %vm181_vm3, %v294_v33 }
 0x357   :  { %v355_v36 = vpop.f32.mrf.mxu1 }
 0x358   :  { %v356_v37 = vadd.f32 %v389_v35, %v355_v36 }
 0x359   :  { %v432_v38 = vpop.f32.mrf.mxu1 }
 0x35a   :  { %361 = vst [vmem:[#allocation11] sm:$0xff] %v356_v37 }
 0x35b   :  { %v358_v39 = vpop.f32.mrf.mxu1 }
 0x35c   :  { %561 = shalt.err (!%p558_p1)
}
 0x35d   :  { %371 = dma.vmem_to_hbm [thread:$0]  %s369_s17, 128, %s693_s9, [#allocation4]   ;;  %v433_v40 = vpop.f32.mrf.mxu1 }
 0x35e   :  { %576 = dma.done.wait [#allocation4], 128  }
 0x35f   :  { %577 = vsyncadd [#allocation4], 4294967168 }
 0x360   :  { %375 = vsyncpa [#allocation3], 1 }
 0x361   :  { %376 = vsyncpa [#allocation6], 1 }
 0x362   :  { %377 = vsyncpa [#allocation9], 1 }
 0x363   :  { %378 = vsyncpa [#allocation4], 1 }

</bundles_post_ra>
